<compile_context>
chip_gen: v6e
topology: v6e:2x2x1
jax: 0.10.0
libtpu: 0.0.40
codegen_flags: <defaults>
</compile_context>

<pallas_src>
import functools

import jax
import jax.numpy as jnp
from jax.experimental import pallas as pl
from jax.experimental.pallas import tpu as pltpu

NEG_SLOPE = 0.2


def _leaky_relu(x):
    return jnp.where(x > 0, x, NEG_SLOPE * x)


def _round_up(n, m):
    return ((n + m - 1) // m) * m


def discriminator_kernel(x_ref, w1_ref, b1_ref, w2_ref, b2_ref, w3t_ref,
                         b3_ref, o_ref, *, compute_dtype):
    cdt = compute_dtype

    # Cast the streamed tile on the VPU (hidden under the DMA) instead of
    # paying an extra materialized HBM copy in the wrapper.
    x = x_ref[...].astype(cdt)                                   # (tb, image)

    # fc1 + LeakyReLU (MXU, f32 accumulation)
    h = jnp.dot(x, w1_ref[...].astype(cdt),
                preferred_element_type=jnp.float32)
    h = _leaky_relu(h + b1_ref[...])                             # (tb, hid) f32

    # fc2 + LeakyReLU
    h = jnp.dot(h.astype(cdt), w2_ref[...].astype(cdt),
                preferred_element_type=jnp.float32)
    h = _leaky_relu(h + b2_ref[...])                             # (tb, hid) f32

    # fc3 (N=1): VPU multiply + XLU lane reduction -- avoids driving the MXU
    # for a single output column and its masked result drain.
    w3 = w3t_ref[...].astype(jnp.float32)                        # (1, hid)
    out = jnp.sum(h * w3, axis=-1)                               # (tb,) f32
    out = out + b3_ref[0, 0]                                     # scalar (SMEM)

    # Lane-dense store: one (1, 1, tb) row per grid step.
    o_ref[...] = out.reshape(o_ref.shape).astype(o_ref.dtype)


def _vmem_capacity_bytes():
    try:
        cap = getattr(pltpu.get_tpu_info(), "vmem_capacity_bytes", None)
        if cap:
            return int(cap)
    except Exception:
        pass
    return 64 * 1024 * 1024   # conservative fallback: v7x per-core VMEM


def _vmem_estimate_bytes(tb, image_size, hidden, x_itemsize):
    x_bytes = 2 * tb * image_size * x_itemsize            # double-buffered x tile
    # Constant-index weights/biases are still double-buffer allocated; they
    # stream in their original f32 dtype.
    w_bytes = 2 * 4 * (image_size * hidden + hidden * hidden + 3 * hidden + 1)
    h_bytes = 2 * tb * hidden * 4                          # f32 intermediates
    o_bytes = 2 * tb * 4                                   # double-buffered out row
    return x_bytes + w_bytes + h_bytes + o_bytes


def _choose_tile(B, max_tile):
    """16-aligned batch tile: prefer >=4 grid steps with a 256-1024 row tile
    (>=2 per TensorCore on v7x), bounded pad waste, then the largest tile."""
    candidates = [t for t in (1024, 512, 256, 128, 64, 32, 16) if t <= max_tile]
    best_score, best_tb = None, candidates[-1]
    for t in candidates:
        b_pad = _round_up(B, t)
        steps = b_pad // t
        waste = b_pad - B
        if steps >= 4 and t >= 256:
            cat = 0                       # big tile, pipelined on both cores
        elif steps >= 2:
            cat = 1                       # at least some DMA/compute overlap
        else:
            cat = 2
        score = (cat, (waste * 16) // b_pad, -t)
        if best_score is None or score < best_score:
            best_score, best_tb = score, t
    return best_tb


def discriminator_forward(x, params, *, compute_dtype=jnp.bfloat16):
    """x: (B, image_size).  params: dict with w1,b1,w2,b2,w3,b3;
    weights stored as (in_features, out_features), biases as (1, out)."""
    B, image_size = x.shape
    hidden = params["w1"].shape[1]
    x_itemsize = jnp.dtype(x.dtype).itemsize

    # VMEM-gated tile ceiling (64 MiB/core on v7x, 128 MiB on v5e/v6e).
    cap = _vmem_capacity_bytes()
    budget = int(0.7 * cap)
    max_tile = 1024
    while max_tile > 16 and _vmem_estimate_bytes(
            max_tile, image_size, hidden, x_itemsize) > budget:
        max_tile //= 2

    tb = _choose_tile(B, max_tile)
    b_pad = _round_up(B, tb)
    num_steps = b_pad // tb
    if b_pad != B:
        # Pad in the ORIGINAL dtype only (no dtype-changing wrapper copy).
        x = jnp.pad(x, ((0, b_pad - B), (0, 0)))

    est = _vmem_estimate_bytes(tb, image_size, hidden, x_itemsize)
    vmem_limit = None
    if est > 28 * 1024 * 1024:            # raise above the default scoped limit
        vmem_limit = min(int(est * 1.25) + (4 << 20), cap)

    w3t = params["w3"].reshape(1, hidden)             # (hidden, 1) -> (1, hidden)
    b3 = params["b3"].reshape(1, 1).astype(jnp.float32)

    kernel = functools.partial(discriminator_kernel,
                               compute_dtype=compute_dtype)
    const = lambda i: (0, 0)   # weights/biases: fetched once, resident in VMEM

    out = pl.pallas_call(
        kernel,
        out_shape=jax.ShapeDtypeStruct((num_steps, 1, tb), jnp.float32),
        grid_spec=pltpu.PrefetchScalarGridSpec(
            num_scalar_prefetch=0,
            grid=(num_steps,),
            in_specs=[
                pl.BlockSpec((tb, image_size), lambda i: (i, 0)),      # x tile
                pl.BlockSpec((image_size, hidden), const),             # w1
                pl.BlockSpec((1, hidden), const),                      # b1
                pl.BlockSpec((hidden, hidden), const),                 # w2
                pl.BlockSpec((1, hidden), const),                      # b2
                pl.BlockSpec((1, hidden), const),                      # w3^T
                pl.BlockSpec(memory_space=pltpu.MemorySpace.SMEM),     # b3
            ],
            out_specs=pl.BlockSpec((1, 1, tb), lambda i: (i, 0, 0)),
        ),
        compiler_params=pltpu.CompilerParams(
            dimension_semantics=("parallel",),
            vmem_limit_bytes=vmem_limit),
    )(x, params["w1"], params["b1"], params["w2"], params["b2"], w3t, b3)

    return out.reshape(-1)[:B].reshape(B, 1)


def init_params(key, image_size, hidden_size):
    """Deterministic init mimicking nn.Linear's U(-1/sqrt(fan_in), 1/sqrt(fan_in))."""
    ks = jax.random.split(key, 6)

    def linear(kw, kb, fan_in, fan_out):
        bound = 1.0 / jnp.sqrt(jnp.float32(fan_in))
        w = jax.random.uniform(kw, (fan_in, fan_out), jnp.float32, -bound, bound)
        b = jax.random.uniform(kb, (1, fan_out), jnp.float32, -bound, bound)
        return w, b

    w1, b1 = linear(ks[0], ks[1], image_size, hidden_size)
    w2, b2 = linear(ks[2], ks[3], hidden_size, hidden_size)
    w3, b3 = linear(ks[4], ks[5], hidden_size, 1)
    return {"w1": w1, "b1": b1, "w2": w2, "b2": b2, "w3": w3, "b3": b3}


def reference_forward(x, p):
    h = x @ p["w1"] + p["b1"]
    h = jnp.where(h > 0, h, NEG_SLOPE * h)
    h = h @ p["w2"] + p["b2"]
    h = jnp.where(h > 0, h, NEG_SLOPE * h)
    return h @ p["w3"] + p["b3"]


if __name__ == "__main__":
    key = jax.random.PRNGKey(0)
    kx, kp = jax.random.split(key)

    batch = 30           # deliberately NOT a multiple of 16: exercises pad path
    image_size = 256
    hidden_size = 128

    x = jax.random.normal(kx, (batch, image_size), dtype=jnp.float32)
    params = init_params(kp, image_size, hidden_size)
    ref = reference_forward(x, params)

    # f32 compute path: tight tolerance vs the f32 reference.
    out_f32 = jax.block_until_ready(
        discriminator_forward(x, params, compute_dtype=jnp.float32))
    assert out_f32.shape == (batch, 1), out_f32.shape
    assert jnp.allclose(out_f32, ref, atol=1e-4, rtol=1e-4), "f32 mismatch"

    # bf16 MXU path (default): bf16-rounding tolerance.
    out_bf16 = jax.block_until_ready(discriminator_forward(x, params))
    assert out_bf16.shape == (batch, 1), out_bf16.shape
    assert jnp.allclose(out_bf16, ref, atol=3e-2, rtol=3e-2), "bf16 mismatch"

    print("KERNEL_OK")
</pallas_src>

<mosaic_0001>
module attributes {stable_mosaic.version = 11 : i64} {
  func.func @discriminator_kernel(%arg0: i32, %arg1: memref<16x256xf32, #tpu.memory_space<vmem>>, %arg2: memref<256x128xf32, #tpu.memory_space<vmem>>, %arg3: memref<1x128xf32, #tpu.memory_space<vmem>>, %arg4: memref<128x128xf32, #tpu.memory_space<vmem>>, %arg5: memref<1x128xf32, #tpu.memory_space<vmem>>, %arg6: memref<1x128xf32, #tpu.memory_space<vmem>>, %arg7: memref<1x1xf32, #tpu.memory_space<smem>>, %arg8: memref<1x1x16xf32, #tpu.memory_space<vmem>>) attributes {dimension_semantics = [#tpu.dimension_semantics<parallel>], iteration_bounds = array<i64: 2>, scalar_prefetch = 0 : i64, scratch_operands = 0 : i64, tpu.core_type = #tpu.core_type<tc>, window_params = [{transform_indices = @transform_0, window_bounds = array<i64: 16, 256>}, {pipeline_mode = #tpu.pipeline_mode<synchronous>, transform_indices = @transform_1, window_bounds = array<i64: 256, 128>}, {pipeline_mode = #tpu.pipeline_mode<synchronous>, transform_indices = @transform_2, window_bounds = array<i64: 1, 128>}, {pipeline_mode = #tpu.pipeline_mode<synchronous>, transform_indices = @transform_3, window_bounds = array<i64: 128, 128>}, {pipeline_mode = #tpu.pipeline_mode<synchronous>, transform_indices = @transform_4, window_bounds = array<i64: 1, 128>}, {pipeline_mode = #tpu.pipeline_mode<synchronous>, transform_indices = @transform_5, window_bounds = array<i64: 1, 128>}, {transform_indices = @transform_6, window_bounds = array<i64: 1, 1>}, {transform_indices = @transform_7, window_bounds = array<i64: 1, 1, 16>}]} {
    %c0 = arith.constant 0 : index
    %c0_0 = arith.constant 0 : index
    %0 = vector.load %arg1[%c0, %c0_0] : memref<16x256xf32, #tpu.memory_space<vmem>>, vector<16x256xf32>
    %c0_1 = arith.constant 0 : index
    %c0_2 = arith.constant 0 : index
    %1 = vector.load %arg2[%c0_1, %c0_2] : memref<256x128xf32, #tpu.memory_space<vmem>>, vector<256x128xf32>
    %cst = arith.constant dense<0.000000e+00> : vector<16x128xf32>
    %2 = tpu.matmul %0, %1, %cst {dimension_numbers = #tpu.dot_dimension_numbers<[1], [0], [0], [1], [0, 0, 1, 1], [], []>} : vector<16x256xf32>, vector<256x128xf32>, vector<16x128xf32> -> vector<16x128xf32>
    %c0_3 = arith.constant 0 : index
    %c0_4 = arith.constant 0 : index
    %3 = vector.load %arg3[%c0_3, %c0_4] : memref<1x128xf32, #tpu.memory_space<vmem>>, vector<1x128xf32>
    %4 = vector.broadcast %3 : vector<1x128xf32> to vector<16x128xf32>
    %5 = arith.addf %2, %4 : vector<16x128xf32>
    %cst_5 = arith.constant 0.000000e+00 : f32
    %6 = vector.broadcast %cst_5 : f32 to vector<16x128xf32>
    %7 = arith.cmpf ogt, %5, %6 : vector<16x128xf32>
    %cst_6 = arith.constant 2.000000e-01 : f32
    %8 = vector.broadcast %cst_6 : f32 to vector<16x128xf32>
    %9 = arith.mulf %8, %5 : vector<16x128xf32>
    %10 = arith.select %7, %5, %9 : vector<16x128xi1>, vector<16x128xf32>
    %c0_7 = arith.constant 0 : index
    %c0_8 = arith.constant 0 : index
    %11 = vector.load %arg4[%c0_7, %c0_8] : memref<128x128xf32, #tpu.memory_space<vmem>>, vector<128x128xf32>
    %cst_9 = arith.constant dense<0.000000e+00> : vector<16x128xf32>
    %12 = tpu.matmul %10, %11, %cst_9 {dimension_numbers = #tpu.dot_dimension_numbers<[1], [0], [0], [1], [0, 0, 1, 1], [], []>} : vector<16x128xf32>, vector<128x128xf32>, vector<16x128xf32> -> vector<16x128xf32>
    %c0_10 = arith.constant 0 : index
    %c0_11 = arith.constant 0 : index
    %13 = vector.load %arg5[%c0_10, %c0_11] : memref<1x128xf32, #tpu.memory_space<vmem>>, vector<1x128xf32>
    %14 = vector.broadcast %13 : vector<1x128xf32> to vector<16x128xf32>
    %15 = arith.addf %12, %14 : vector<16x128xf32>
    %cst_12 = arith.constant 0.000000e+00 : f32
    %16 = vector.broadcast %cst_12 : f32 to vector<16x128xf32>
    %17 = arith.cmpf ogt, %15, %16 : vector<16x128xf32>
    %cst_13 = arith.constant 2.000000e-01 : f32
    %18 = vector.broadcast %cst_13 : f32 to vector<16x128xf32>
    %19 = arith.mulf %18, %15 : vector<16x128xf32>
    %20 = arith.select %17, %15, %19 : vector<16x128xi1>, vector<16x128xf32>
    %c0_14 = arith.constant 0 : index
    %c0_15 = arith.constant 0 : index
    %21 = vector.load %arg6[%c0_14, %c0_15] : memref<1x128xf32, #tpu.memory_space<vmem>>, vector<1x128xf32>
    %22 = vector.broadcast %21 : vector<1x128xf32> to vector<16x128xf32>
    %23 = arith.mulf %20, %22 : vector<16x128xf32>
    %cst_16 = arith.constant dense<0.000000e+00> : vector<16xf32>
    %24 = vector.multi_reduction <add>, %23, %cst_16 [1] : vector<16x128xf32> to vector<16xf32>
    %c0_17 = arith.constant 0 : index
    %c0_18 = arith.constant 0 : index
    %25 = memref.load %arg7[%c0_17, %c0_18] : memref<1x1xf32, #tpu.memory_space<smem>>
    %26 = vector.broadcast %25 : f32 to vector<16xf32>
    %27 = arith.addf %24, %26 : vector<16xf32>
    %28 = vector.shape_cast %27 : vector<16xf32> to vector<1x1x16xf32>
    %c0_19 = arith.constant 0 : index
    %c0_20 = arith.constant 0 : index
    %c0_21 = arith.constant 0 : index
    %29 = vector.load %arg8[%c0_19, %c0_20, %c0_21] : memref<1x1x16xf32, #tpu.memory_space<vmem>>, vector<1x1x16xf32>
    tpu.vector_store %arg8[%c0_19, %c0_20, %c0_21], %28 {strides = array<i32>} : memref<1x1x16xf32, #tpu.memory_space<vmem>>, vector<1x1x16xf32>,
    return
  }
  func.func @transform_0(%arg0: i32) -> (i32, i32) {
    %c0_i32 = arith.constant 0 : i32
    %c0_i32_0 = arith.constant 0 : i32
    return %arg0, %c0_i32 : i32, i32
  }
  func.func @transform_1(%arg0: i32) -> (i32, i32) {
    %c0_i32 = arith.constant 0 : i32
    %c0_i32_0 = arith.constant 0 : i32
    %c0_i32_1 = arith.constant 0 : i32
    return %c0_i32, %c0_i32_0 : i32, i32
  }
  func.func @transform_2(%arg0: i32) -> (i32, i32) {
    %c0_i32 = arith.constant 0 : i32
    %c0_i32_0 = arith.constant 0 : i32
    %c0_i32_1 = arith.constant 0 : i32
    return %c0_i32, %c0_i32_0 : i32, i32
  }
  func.func @transform_3(%arg0: i32) -> (i32, i32) {
    %c0_i32 = arith.constant 0 : i32
    %c0_i32_0 = arith.constant 0 : i32
    %c0_i32_1 = arith.constant 0 : i32
    return %c0_i32, %c0_i32_0 : i32, i32
  }
  func.func @transform_4(%arg0: i32) -> (i32, i32) {
    %c0_i32 = arith.constant 0 : i32
    %c0_i32_0 = arith.constant 0 : i32
    %c0_i32_1 = arith.constant 0 : i32
    return %c0_i32, %c0_i32_0 : i32, i32
  }
  func.func @transform_5(%arg0: i32) -> (i32, i32) {
    %c0_i32 = arith.constant 0 : i32
    %c0_i32_0 = arith.constant 0 : i32
    %c0_i32_1 = arith.constant 0 : i32
    return %c0_i32, %c0_i32_0 : i32, i32
  }
  func.func @transform_6(%arg0: i32) -> (i32, i32) {
    %c0_i32 = arith.constant 0 : i32
    %c0_i32_0 = arith.constant 0 : i32
    %c0_i32_1 = arith.constant 0 : i32
    return %c0_i32, %c0_i32_0 : i32, i32
  }
  func.func @transform_7(%arg0: i32) -> (i32, i32, i32) {
    %c0_i32 = arith.constant 0 : i32
    %c0_i32_0 = arith.constant 0 : i32
    %c0_i32_1 = arith.constant 0 : i32
    return %arg0, %c0_i32, %c0_i32_0 : i32, i32, i32
  }
}

</mosaic_0001>

<bundles_post_ra>
// kernel: tpu_custom_call.1
= control target key start
LH: loop header
LB: loop body
LE: loop exit
PB: predicated region body
PF: predicated region fallthrough
CT: control target
= control target key end

     0   :  { %s1269_s0 = inlined_call_operand.hbm [shape: f32[32,256], index: 0, kind: input, shape index: {}]   ;;  %s1270_s1 = inlined_call_operand.hbm [shape: f32[256,128], index: 1, kind: input, shape index: {}]   ;;  %s1271_s2 = inlined_call_operand.vmem [shape: f32[1,128], index: 2, kind: input, shape index: {}]   ;;  %s1272_s3 = inlined_call_operand.hbm [shape: f32[128,128], index: 3, kind: input, shape index: {}]   ;;  %s1273_s4 = inlined_call_operand.vmem [shape: f32[1,128], index: 4, kind: input, shape index: {}]   ;;  %s1274_s5 = inlined_call_operand.vmem [shape: f32[1,128], index: 5, kind: input, shape index: {}]   ;;  %s1275_s6 = inlined_call_operand.<no memory space> [shape: f32[1,1], index: 6, kind: input, shape index: {}]   ;;  %s1276_s7 = inlined_call_operand.hbm [shape: f32[2,1,16], index: 7, kind: output, shape index: {}]  }
   0x1   :  { %12 = sst [smem:[#allocation2]] %s1275_s6 }
   0x2   :  { %13 = vsyncpa [#allocation4], 0 }
   0x3   :  { %15 = vsyncpa [#allocation4 + $0x1], 0 }
   0x4   :  { %16 = vsyncpa [#allocation7], 0 }
   0x5   :  { %17 = vsyncpa [#allocation5], 0 }
   0x6   :  { %19 = vsyncpa [#allocation5 + $0x1], 0  ;;  %s1073_s26 = smov 0   ;;  %s1075_s27 = smov 0  }
   0x7   :  { %s1077_s28 = smov 0   ;;  %s1079_s29 = smov 0  }
   0x8 LB: > { %s1094_s6 = sadd.s32 4294967295, %s1020_s29   ;;  %s689_s30 = sadd.s32 4294967294, %s1020_s29   ;;  %s1020_s29 = sphi %s1079_s29, %s1298_s29   ;;  %s1016_s28 = sphi %s1077_s28, %s1297_s28   ;;  %s1012_s27 = sphi %s1075_s27, %s1296_s27   ;;  %s1008_s26 = sphi %s1073_s26, %s1295_s26  }
   0x9   : > { %p45_p0 = scmp.ne.s32.totalorder %s1012_s27, %s1008_s26  ;;  %p1277_p1 = scmp.eq.s32.totalorder %s1094_s6, 0 }
   0xa   : > { %p201_p3 = scmp.eq.s32.totalorder %s689_s30, 1  ;;  %p690_p5 = scmp.ge.s32.totalorder %s1020_s29, 1 }
   0xb   : > { %p1103_p4 = por %p1277_p1, %p45_p0  ;;  %p208_p7 = scmp.lt.s32.totalorder %s1020_s29, 3 }
   0xc   : > { %p1108_p6 = por %p201_p3, %p45_p0  ;;  %s1022_s11 = smov [#allocation6]  }
   0xd   : > { %s1281_s8 = scalar_select %p1103_p4, 1, 0 }
   0xe   : > { %s1282_s9 = scalar_select %p1108_p6, 1, 0 }
   0xf   : > { %p1113_p8 = pnand %p690_p5, %p208_p7  ;;  %s220_s12 = sshll.u32 %s1022_s11, 4  ;;  %s221_s12 = int_to_ptr.vmem [resolvable:$true] %s220_s12 }
  0x10   : > { %s1023_s14 = smov [#allocation8]   ;;  %s883_s16 = scalar_lea.vmem %s221_s12, 4096 }
  0x11   : > { %s1283_s10 = scalar_select %p1113_p8, 1, 0 }
  0x12   : > { %p813_p9 = pneg %p1113_p8  ;;  %s236_s15 = sshll.u32 %s1023_s14, 4  ;;  %s237_s15 = int_to_ptr.vmem [resolvable:$true] %s236_s15 }
  0x13   : > { %p884_p13 = scmp.ne.s32.totalorder %s221_s12, %s883_s16  ;;  %p891_p5 = scmp.lt.s32.totalorder %s221_s12, %s221_s12 }
  0x14   : > { %p1122_p11 = pnand %p813_p9, %p1277_p1  ;;  %p892_p7 = scmp.lt.s32.totalorder %s883_s16, %s883_s16 }
  0x16   : > { %p874_p12 = pneg %p1122_p11  ;;  %p893_p10 = por %p892_p7, %p891_p5 }
  0x18   : > { %p886_p0 = pnand %p884_p13, %p874_p12 }
  0x1a   : > { %p887_p3 = pneg %p886_p0 }
  0x1c   : > { %p894_p9 = pnand %p893_p10, %p887_p3 }
  0x1e   : > { %897 = shalt.err (!%p894_p9)
}
  0x1f   : > { %s1024_s17 = smov 128   ;;  %s1025_s18 = smov 8  }
  0x20   : > { %816 = dma.hbm_to_vmem [thread:$0]  (!%p1122_p11), %s1270_s1, 4096, %s221_s12, [#allocation7], %s1024_s17, %s1024_s17, %s1025_s18  }
  0x21   : > { %s909_s21 = scalar_lea.vmem %s237_s15, 2048  ;;  %p917_p2 = scmp.lt.s32.totalorder %s237_s15, %s237_s15 }
  0x22   : > { %p910_p1 = scmp.ne.s32.totalorder %s237_s15, %s909_s21  ;;  %p918_p6 = scmp.lt.s32.totalorder %s909_s21, %s909_s21 }
  0x24   : > { %p912_p13 = pnand %p910_p1, %p874_p12  ;;  %p919_p5 = por %p918_p6, %p917_p2 }
  0x26   : > { %p913_p0 = pneg %p912_p13 }
  0x28   : > { %p920_p10 = pnand %p919_p5, %p913_p0 }
  0x2a   : > { %923 = shalt.err (!%p920_p10)
}
  0x2b   : > { %819 = dma.hbm_to_vmem [thread:$0]  (!%p1122_p11), %s1272_s3, 2048, %s237_s15, [#allocation7], %s1024_s17, %s1024_s17, %s1025_s18  }
  0x2c   : > { %s1145_s24 = sadd.s32 1, %s1020_s29   ;;  %s32_s25 = sadd.s32 1, %s1016_s28 }
  0x2d   : > { %s29_s30 = ssub.s32 %s1020_s29, %s1145_s24  ;;  %p39_p1 = scmp.ne.s32.totalorder %s1016_s28, %s1012_s27 }
  0x2e   : > { %p30_p2 = scmp.eq.s32.totalorder %s29_s30, 0  ;;  %p40_p6 = scmp.eq.s32.totalorder %s1020_s29, 0 }
  0x2f   : > { %p1285_p12 = scmp.eq.s32.totalorder %s1094_s6, 1  ;;  %p830_p7 = scmp.lt.s32.totalorder %s1020_s29, 2 }
  0x30   : > { %s1161_s12 = scalar_select %p30_p2, %s1016_s28, %s32_s25  }
  0x31   : > { %p1155_p3 = por %p1285_p12, %p39_p1  ;;  %p41_p9 = por %p40_p6, %p39_p1 }
  0x32   : > { %s259_s13 = sand.u32 1, %s1016_s28   ;;  %s709_s15 = sshll.u32 %s1020_s29, 9 }
  0x33   : > { %s1286_s11 = scalar_select %p1155_p3, 1, 0 }
  0x34   : > { %s694_s14 = sshll.u32 %s259_s13, 5  ;;  %s1168_s18 = scalar_lea.hbm %s1269_s0, %s709_s15 }
  0x35   : > { %s263_s19 = scalar_lea.vmem [#allocation3], %s694_s14  ;;  %p1172_p11 = pnand %p830_p7, %p41_p9 }
  0x36   : > { %s271_s20 = sshll.u32 %s263_s19, 4  ;;  %s1176_s22 = scalar_lea.sflag [#allocation4], %s259_s13  ;;  %s1170_s20 = int_to_ptr.vmem [resolvable:$true] %s271_s20 }
  0x37   : > { %s924_s23 = scalar_lea.hbm %s1168_s18, 512  ;;  %p926_p0 = pneg %p1172_p11 }
  0x38   : > { %p925_p13 = scmp.ne.s32.totalorder %s1168_s18, %s924_s23  ;;  %s929_s14 = scalar_lea.hbm %s1269_s0, 1024 }
  0x39   : > { %p930_p1 = scmp.lt.s32.totalorder %s1168_s18, %s1269_s0  ;;  %p931_p2 = scmp.lt.s32.totalorder %s929_s14, %s924_s23 }
  0x3a   : > { %p927_p5 = pnand %p926_p0, %p925_p13 }
  0x3b   : > { %p932_p6 = por %p931_p2, %p930_p1 }
  0x3c   : > { %p928_p10 = pneg %p927_p5 }
  0x3e   : > { %p933_p12 = pnand %p932_p6, %p928_p10 }
  0x40   : > { %936 = shalt.err (!%p933_p12)
}
  0x41   : > { %s937_s13 = scalar_lea.vmem %s1170_s20, 512  ;;  %s1026_s17 = smov [#allocation3]  }
  0x42   : > { %p938_p7 = scmp.ne.s32.totalorder %s1170_s20, %s937_s13  ;;  %s942_s19 = sshll.u32 %s1026_s17, 4  ;;  %s943_s19 = int_to_ptr.vmem [resolvable:$false] %s942_s19 }
  0x43   : > { %s944_s25 = scalar_lea.vmem %s943_s19, 1024  ;;  %p945_p5 = scmp.lt.s32.totalorder %s1170_s20, %s943_s19 }
  0x44   : > { %p940_p9 = pnand %p938_p7, %p926_p0  ;;  %p946_p3 = scmp.lt.s32.totalorder %s944_s25, %s937_s13 }
  0x46   : > { %p941_p13 = pneg %p940_p9  ;;  %p947_p4 = por %p946_p3, %p945_p5 }
  0x48   : > { %p948_p8 = pnand %p947_p4, %p941_p13 }
  0x4a   : > { %951 = shalt.err (!%p948_p8)
}
  0x4b   : > { %s1027_s23 = smov 256   ;;  %s1028_s30 = smov 16  }
  0x4c   : > { %823 = dma.hbm_to_vmem [thread:$0]  (!%p1172_p11), %s1168_s18, 512, %s1170_s20, %s1176_s22, %s1027_s23, %s1027_s23, %s1028_s30  }
  0x4d   : > { %p1288_p0 = scmp.ne.s32.totalorder %s1283_s10, 0 }
  0x4e   : > { %s1200_s14 = sand.u32 (!%p1288_p0), 1, %s1012_s27   ;;  %p1289_p4 = scmp.ne.s32.totalorder (!%p1288_p0), %s1281_s8, 0 }
  0x4f   : > { %283 = sbr.rel (%p1288_p0) target bundleno = 689 (0x2b1), region = 48  ;;  %s699_s15 = sshll.u32 (!%p1288_p0), %s1200_s14, 5 }
  0x50   : > { %s286_s16 = scalar_lea.sflag (!%p1288_p0), [#allocation4], %s1200_s14  ;;  %s1204_s13 = scalar_lea.vmem (!%p1288_p0), [#allocation3], %s699_s15 }
  0x54   : > { %995 = dma.done.wait (%p1289_p4), %s286_s16, 512  }
  0x55   : > { %997 = vsyncadd (%p1289_p4), %s286_s16, 4294966784  ;;  %p1290_p8 = scmp.eq.s32.totalorder %s1094_s6, 0 }
  0x57   : > { %999 = dma.done.wait (%p1290_p8), [#allocation7], 6144   ;;  %p1291_p3 = pmov %p1290_p8 }
  0x58   : > { %v363_v0 = vld [vmem:[#allocation6 + $0xf8] sm:$0xff]  ;;  %v362_v2 = vld [vmem:[#allocation6 + $0xf0] sm:$0xff]  ;;  %v361_v4 = vld [vmem:[#allocation6 + $0xe8] sm:$0xff]  ;;  %s569_s17 = sld [smem:[#allocation2]]  ;;  %s705_s19 = sshll.u32 %s1094_s6, 4  ;;  %vm586_vm4 = vcmask 130112  }
  0x59   : > { %1001 = vsyncadd (%p1291_p3), [#allocation7], 4294961152  ;;  %v347_v1 = vld [vmem:[#allocation6 + $0x78] sm:$0xff]  ;;  %710 = vmatprep.subr.mxu0 %v363_v0  ;;  %v346_v3 = vld [vmem:[#allocation6 + $0x70] sm:$0xff]  ;;  %s326_s25 = scalar_lea.vmem [#allocation9], %s1200_s14  ;;  %vm589_vm5 = vcmask 122880   ;;  %s1232_s16 = scalar_lea.hbm %s1276_s7, %s705_s19 }
  0x5a   : > { %711 = vmatpush3.msra.mxu0 %v347_v1  ;;  %v345_v5 = vld [vmem:[#allocation6 + $0x68] sm:$0xff]  ;;  %v360_v6 = vld [vmem:[#allocation6 + $0xe0] sm:$0xff]  ;;  %v359_v8 = vld [vmem:[#allocation6 + $0xd8] sm:$0xff]  ;;  %s604_s23 = sshll.u32 %s326_s25, 4  ;;  %p1292_p10 = scmp.ne.s32.totalorder %s1286_s11, 0  ;;  %s605_s23 = int_to_ptr.vmem [resolvable:$true] %s604_s23 }
  0x5b   : > { %712 = vmatprep.subr.mxu0 %v362_v2  ;;  %v344_v7 = vld [vmem:[#allocation6 + $0x60] sm:$0xff]  ;;  %v343_v9 = vld [vmem:[#allocation6 + $0x58] sm:$0xff]  ;;  %v358_v10 = vld [vmem:[#allocation6 + $0xd0] sm:$0xff]  ;;  %s952_s8 = scalar_lea.vmem %s605_s23, 16  ;;  %s1029_s6 = smov [#allocation9]  }
  0x5c   : > { %713 = vmatpush3.msra.mxu0 %v346_v3  ;;  %v342_v11 = vld [vmem:[#allocation6 + $0x50] sm:$0xff]  ;;  %v357_v12 = vld [vmem:[#allocation6 + $0xc8] sm:$0xff]  ;;  %v356_v15 = vld [vmem:[#allocation6 + $0xc0] sm:$0xff]  ;;  %p953_p11 = scmp.ne.s32.totalorder %s605_s23, %s952_s8  ;;  %s956_s10 = sshll.u32 %s1029_s6, 4  ;;  %s957_s10 = int_to_ptr.vmem [resolvable:$false] %s956_s10 }
  0x5d   : > { %714 = vmatprep.subr.mxu0 %v361_v4  ;;  %v329_v13 = vld [vmem:[%s1204_s13 + $0x8] sm:$0xff]  ;;  %v467_v16 = vld [vmem:[#allocation8 + $0x78] sm:$0xff]  ;;  %v466_v17 = vld [vmem:[#allocation8 + $0x70] sm:$0xff]  ;;  %s958_s18 = scalar_lea.vmem %s957_s10, 32  ;;  %p959_p6 = scmp.lt.s32.totalorder %s605_s23, %s957_s10 }
  0x5e   : > { %715 = vmatpush3.msra.mxu0 %v345_v5  ;;  %v341_v14 = vld [vmem:[#allocation6 + $0x48] sm:$0xff]  ;;  %435 = vmatprep.mubr.f32.mxu0 %v329_v13  ;;  %v340_v18 = vld [vmem:[#allocation6 + $0x40] sm:$0xff]  ;;  %v355_v19 = vld [vmem:[#allocation6 + $0xb8] sm:$0xff]  ;;  %v575_v13 = vlaneseq  ;;  %p954_p1 = pnand %p953_p11, %p1292_p10  ;;  %p960_p12 = scmp.lt.s32.totalorder %s958_s18, %s952_s8 }
  0x5f   : > { %716 = vmatprep.subr.mxu0 %v360_v6  ;;  %766 = vmatprep.subr.mxu1 %v467_v16  ;;  %v465_v20 = vld [vmem:[#allocation8 + $0x68] sm:$0xff]  ;;  %v339_v21 = vld [vmem:[#allocation6 + $0x38] sm:$0xff]  ;;  %v354_v22 = vld [vmem:[#allocation6 + $0xb0] sm:$0xff] }
  0x60   : > { %717 = vmatpush3.msra.mxu0 %v344_v7  ;;  %767 = vmatpush3.msra.mxu1 %v467_v16  ;;  %v464_v23 = vld [vmem:[#allocation8 + $0x60] sm:$0xff]  ;;  %v338_v24 = vld [vmem:[#allocation6 + $0x30] sm:$0xff]  ;;  %v353_v25 = vld [vmem:[#allocation6 + $0xa8] sm:$0xff]  ;;  %p955_p2 = pneg %p954_p1  ;;  %p961_p7 = por %p960_p12, %p959_p6 }
  0x61   : > { %718 = vmatprep.subr.mxu0 %v359_v8  ;;  %768 = vmatprep.subr.mxu1 %v466_v17  ;;  %v463_v26 = vld [vmem:[#allocation8 + $0x58] sm:$0xff]  ;;  %v337_v27 = vld [vmem:[#allocation6 + $0x28] sm:$0xff]  ;;  %v352_v28 = vld [vmem:[#allocation6 + $0xa0] sm:$0xff] }
  0x62   : > { %719 = vmatpush3.msra.mxu0 %v343_v9  ;;  %769 = vmatpush3.msra.mxu1 %v466_v17  ;;  %v462_v29 = vld [vmem:[#allocation8 + $0x50] sm:$0xff]  ;;  %v336_v30 = vld [vmem:[#allocation6 + $0x20] sm:$0xff]  ;;  %v351_v31 = vld [vmem:[#allocation6 + $0x98] sm:$0xff]  ;;  %v570_v17 = vstv %s569_s17  ;;  %p962_p9 = pnand %p961_p7, %p955_p2 }
  0x63   : > { %720 = vmatprep.subr.mxu0 %v358_v10  ;;  %770 = vmatprep.subr.mxu1 %v465_v20  ;;  %v461_v32 = vld [vmem:[#allocation8 + $0x48] sm:$0xff]  ;;  %v335_v33 = vld [vmem:[#allocation6 + $0x18] sm:$0xff]  ;;  %v350_v34 = vld [vmem:[#allocation6 + $0x90] sm:$0xff] }
  0x64   : > { %721 = vmatpush3.msra.mxu0 %v342_v11  ;;  %771 = vmatpush3.msra.mxu1 %v465_v20  ;;  %v460_v35 = vld [vmem:[#allocation8 + $0x40] sm:$0xff]  ;;  %v334_v36 = vld [vmem:[#allocation6 + $0x10] sm:$0xff]  ;;  %v349_v37 = vld [vmem:[#allocation6 + $0x88] sm:$0xff] }
  0x65   : > { %722 = vmatprep.subr.mxu0 %v357_v12  ;;  %772 = vmatprep.subr.mxu1 %v464_v23  ;;  %v459_v38 = vld [vmem:[#allocation8 + $0x38] sm:$0xff]  ;;  %v333_v39 = vld [vmem:[#allocation6 + $0x8] sm:$0xff]  ;;  %v348_v40 = vld [vmem:[#allocation6 + $0x80] sm:$0xff] }
  0x66   : > { %723 = vmatpush3.msra.mxu0 %v341_v14  ;;  %773 = vmatpush3.msra.mxu1 %v464_v23  ;;  %v332_v41 = vld [vmem:[#allocation6] sm:$0xff]  ;;  %v331_v43 = vld [vmem:[%s1204_s13 + $0x18] sm:$0xff]  ;;  %v330_v44 = vld [vmem:[%s1204_s13 + $0x10] sm:$0xff]  ;;  %v576_v14 = vand.u32 127, %v575_v13 }
  0x67   : > { %724 = vmatprep.subr.mxu0 %v356_v15  ;;  %774 = vmatprep.subr.mxu1 %v463_v26  ;;  %v328_v42 = vld [vmem:[%s1204_s13] sm:$0xff]  ;;  %v458_v45 = vld [vmem:[#allocation8 + $0x30] sm:$0xff]  ;;  %v457_v46 = vld [vmem:[#allocation8 + $0x28] sm:$0xff]  ;;  %v578_v15 = vshrl.u32 %v575_v13, 7  ;;  %s592_s13 = scalar_lea.sflag [#allocation5], %s1200_s14 }
  0x68   : > { %725 = vmatpush3.msra.mxu0 %v340_v18  ;;  %775 = vmatpush3.msra.mxu1 %v463_v26  ;;  %v456_v47 = vld [vmem:[#allocation8 + $0x20] sm:$0xff]  ;;  %v455_v48 = vld [vmem:[#allocation8 + $0x18] sm:$0xff]  ;;  %v454_v49 = vld [vmem:[#allocation8 + $0x10] sm:$0xff]  ;;  %v581_v16 = vadd.s32 4294967288, %v576_v14 }
  0x69   : > { %726 = vmatprep.subr.mxu0 %v355_v19  ;;  %776 = vmatprep.subr.mxu1 %v462_v29  ;;  %v453_v50 = vld [vmem:[#allocation8 + $0x8] sm:$0xff]  ;;  %v452_v51 = vld [vmem:[#allocation8] sm:$0xff]  ;;  %v579_v19 = vsub.s32 %v576_v14, %v578_v15 }
  0x6a   : > { %727 = vmatpush3.msra.mxu0 %v339_v21  ;;  %777 = vmatpush3.msra.mxu1 %v462_v29  ;;  %v702_v53 = vld [vmem:[%s1271_s2] ss:$0 sm:$0xff]  ;;  %v584_v21 = vsub.s32 %v581_v16, %v578_v15 }
  0x6b   : > { %728 = vmatprep.subr.mxu0 %v354_v22  ;;  %778 = vmatprep.subr.mxu1 %v461_v32  ;;  %v703_v1 = vld [vmem:[%s1273_s4] ss:$0 sm:$0xff] }
  0x6c   : > { %729 = vmatpush3.msra.mxu0 %v338_v24  ;;  %779 = vmatpush3.msra.mxu1 %v461_v32  ;;  %v704_v9 = vld [vmem:[%s1274_s5] ss:$0 sm:$0xff] }
  0x6d   : > { %730 = vmatprep.subr.mxu0 %v353_v25  ;;  %780 = vmatprep.subr.mxu1 %v460_v35 }
  0x6e   : > { %731 = vmatpush3.msra.mxu0 %v337_v27  ;;  %781 = vmatpush3.msra.mxu1 %v460_v35 }
  0x6f   : > { %732 = vmatprep.subr.mxu0 %v352_v28  ;;  %782 = vmatprep.subr.mxu1 %v459_v38 }
  0x70   : > { %733 = vmatpush3.msra.mxu0 %v336_v30  ;;  %783 = vmatpush3.msra.mxu1 %v459_v38 }
  0x71   : > { %734 = vmatprep.subr.mxu0 %v351_v31  ;;  %784 = vmatprep.subr.mxu1 %v458_v45 }
  0x72   : > { %735 = vmatpush3.msra.mxu0 %v335_v33  ;;  %785 = vmatpush3.msra.mxu1 %v458_v45 }
  0x73   : > { %736 = vmatprep.subr.mxu0 %v350_v34  ;;  %786 = vmatprep.subr.mxu1 %v457_v46 }
  0x74   : > { %737 = vmatpush3.msra.mxu0 %v334_v36  ;;  %787 = vmatpush3.msra.mxu1 %v457_v46 }
  0x75   : > { %738 = vmatprep.subr.mxu0 %v349_v37  ;;  %788 = vmatprep.subr.mxu1 %v456_v47 }
  0x76   : > { %739 = vmatpush3.msra.mxu0 %v333_v39  ;;  %789 = vmatpush3.msra.mxu1 %v456_v47 }
  0x77   : > { %740 = vmatprep.subr.mxu0 %v348_v40  ;;  %790 = vmatprep.subr.mxu1 %v455_v48 }
  0x78   : > { %741 = vmatpush3.msra.mxu0 %v332_v41  ;;  %791 = vmatpush3.msra.mxu1 %v455_v48 }
  0x79   : > { %436 = vmatmul.mubr.f32.vlgmr.msra.gmra.mxu0 %v328_v42  ;;  %792 = vmatprep.subr.mxu1 %v454_v49 }
  0x7a   : > { %440 = vmatprep.mubr.f32.mxu0 %v331_v43  ;;  %793 = vmatpush3.msra.mxu1 %v454_v49 }
  0x7b   : > { %794 = vmatprep.subr.mxu1 %v453_v50 }
  0x7c   : > { %795 = vmatpush3.msra.mxu1 %v453_v50 }
  0x7d   : > { %441 = vmatmul.mubr.f32.gmra.mxu0 %v330_v44  ;;  %796 = vmatprep.subr.mxu1 %v452_v51 }
  0x7e   : > { %797 = vmatpush3.msra.mxu1 %v452_v51 }
 0x139   : > { %v742_v52 = vpop.f32.mrf.mxu0 }
 0x13b   : > { %v743_v54 = vpop.f32.mrf.mxu0 }
 0x13c   : > { %v744_v55 = vadd.f32 %v743_v54, %v742_v52 }
 0x13d   : > { %v745_v56 = vpop.f32.mrf.mxu0 }
 0x13e   : > { %v438_v57 = vadd.f32 %v744_v55, %v702_v53 }
 0x13f   : > { %v746_v58 = vpop.f32.mrf.mxu0 }
 0x140   : > { %v747_v59 = vadd.f32 %v746_v58, %v745_v56  ;;  %vm446_vm0 = vcmp.gt.f32.partialorder %v438_v57, 0.0  ;;  %v448_v60 = vmul.f32 0.2, %v438_v57 }
 0x142   : > { %v443_v61 = vadd.f32 %v747_v59, %v702_v53  ;;  %v450_v62 = vsel %vm446_vm0, %v438_v57, %v448_v60 }
 0x143   : > { %798 = vmatprep.mubr.f32.mxu1 %v450_v62 }
 0x144   : > { %vm447_vm1 = vcmp.gt.f32.partialorder %v443_v61, 0.0  ;;  %v449_v63 = vmul.f32 0.2, %v443_v61 }
 0x146   : > { %v451_v0 = vsel %vm447_vm1, %v443_v61, %v449_v63 }
 0x147   : > { %799 = vmatmul.mubr.f32.vlgmr.msra.gmra.mxu1 %v451_v0 }
 0x207   : > { %v800_v2 = vpop.f32.mrf.mxu1 }
 0x208   : > { %v547_v3 = vadd.f32 %v800_v2, %v703_v1 }
 0x209   : > { %v541_v4 = vpop.f32.mrf.mxu1 }
 0x20a   : > { %v542_v5 = vadd.f32 %v703_v1, %v541_v4  ;;  %v553_v6 = vmul.f32 0.2, %v547_v3  ;;  %vm551_vm3 = vcmp.gt.f32.partialorder %v547_v3, 0.0 }
 0x20c   : > { %v552_v7 = vmul.f32 0.2, %v542_v5  ;;  %vm550_vm2 = vcmp.gt.f32.partialorder %v542_v5, 0.0  ;;  %v555_v11 = vsel %vm551_vm3, %v547_v3, %v553_v6 }
 0x20d   : > { %v564_v12 = vmul.f32 %v704_v9, %v555_v11 }
 0x20e   : > { %v554_v8 = vsel %vm550_vm2, %v542_v5, %v552_v7 }
 0x20f   : > { %v563_v10 = vmul.f32 %v704_v9, %v554_v8 }
 0x211   : > { %565 = vadd.xlane.f32.xlu0 %v563_v10 }
 0x215   : > { %567 = vadd.xlane.f32.xlu0 %v564_v12 }
 0x29a   : > { %v566_v18 = vpop.xlane.xlu0 %565 }
 0x29b   : > { %v571_v20 = vadd.f32 %v570_v17, %v566_v18 }
 0x29d   : > { %v580_v24 = vrot.slane %v571_v20, %v579_v19 }
 0x29e   : > { %v568_v22 = vpop.xlane.xlu0 %567 }
 0x29f   : > { %v572_v23 = vadd.f32 %v570_v17, %v568_v22 }
 0x2a1   : > { %v585_v25 = vrot.slane %v572_v23, %v584_v21 }
 0x2a3   : > { %v587_v26 = vsel %vm586_vm4, %v585_v25, %v580_v24 }
 0x2a4   : > { %590 = vst.msk [vmem:[%s326_s25] sm:$0x1] %vm589_vm5, %v587_v26 }
 0x2a5   : > { %965 = shalt.err (!%p962_p9)
}
 0x2a6   : > { %s966_s20 = scalar_lea.hbm %s1232_s16, 16  ;;  %s970_s22 = scalar_lea.hbm %s1276_s7, 32 }
 0x2a7   : > { %p967_p13 = scmp.ne.s32.totalorder %s1232_s16, %s966_s20  ;;  %p971_p4 = scmp.lt.s32.totalorder %s1232_s16, %s1276_s7 }
 0x2a8   : > { %p972_p8 = scmp.lt.s32.totalorder %s970_s22, %s966_s20 }
 0x2a9   : > { %p968_p5 = pnand %p967_p13, %p1292_p10 }
 0x2aa   : > { %p973_p3 = por %p972_p8, %p971_p4 }
 0x2ab   : > { %p969_p0 = pneg %p968_p5 }
 0x2ad   : > { %p974_p11 = pnand %p973_p3, %p969_p0 }
 0x2af   : > { %977 = shalt.err (!%p974_p11)
}
 0x2b0   : > { %811 = dma.vmem_to_hbm [thread:$0]  (%p1292_p10), %s605_s23, 16, %s1232_s16, %s592_s13  }
 0x2b1 PF: > { %s616_s25 = sand.u32 1, %s1008_s26   ;;  %p1293_p1 = scmp.ne.s32.totalorder %s1282_s9, 0 }
 0x2b2   : > { %p1294_p2 = scmp.ge.s32.totalorder %s1020_s29, 2  ;;  %s617_s30 = scalar_lea.sflag [#allocation5], %s616_s25 }
 0x2b4   : > { %p825_p6 = pnand %p1294_p2, %p1293_p1 }
 0x2b6   : > { %p826_p12 = pneg %p825_p6 }
 0x2b8   : > { %1003 = dma.done.wait (%p826_p12), %s617_s30, 16  }
 0x2b9   : > { %1005 = vsyncadd (%p826_p12), %s617_s30, 4294967280  ;;  %p22_p7 = scmp.ge.s32.totalorder %s1145_s24, 4   ;;  %s1295_s26 = smov %s1012_s27 }
 0x2ba   : > { %s1296_s27 = smov %s1016_s28  ;;  %s1297_s28 = smov %s1161_s12 }
 0x2bb   : > { %s1298_s29 = smov %s1145_s24  ;;  %24 = sbr.rel (!%p22_p7) target bundleno = 8 (0x8), region = 101 }
 0x2c0   :  { %621 = vsyncpa [#allocation4], 1 }
 0x2c1   :  { %623 = vsyncpa [#allocation4 + $0x1], 1 }
 0x2c2   :  { %624 = vsyncpa [#allocation7], 1 }
 0x2c3   :  { %625 = vsyncpa [#allocation5], 1 }
 0x2c4   :  { %627 = vsyncpa [#allocation5 + $0x1], 1 }

</bundles_post_ra>
